<compile_context>
chip_gen: v7x
topology: tpu7x:2x2x1
jax: 0.10.0
libtpu: 0.0.40
codegen_flags: <defaults>
</compile_context>

<pallas_src>
import jax
import jax.numpy as jnp
from jax import lax
from jax.experimental import pallas as pl
from jax.experimental.pallas import tpu as pltpu


def _make_kernel(N, Cin, H, W, Cout, KH, KW):
    Hout = H - KH + 1
    Wout = W - KW + 1
    K = KH * KW * Cin                    # im2col contraction depth (27)
    Q = (Hout - 1) * W + Wout            # padded flat-spatial window length (222)
    P = Hout * Wout                      # compact output spatial length (196)
    inv_count = 1.0 / float(N * Hout * Wout)

    def kernel(x_ref, w_ref, gamma_ref, beta_ref, eps_ref, scale_ref,
               o_ref, patches_ref, sum_ref, ssq_ref):
        n = pl.program_id(0)

        # -------- init per-channel stats accumulators on the first step --------
        @pl.when(n == 0)
        def _init():
            sum_ref[...] = jnp.zeros_like(sum_ref)
            ssq_ref[...] = jnp.zeros_like(ssq_ref)

        # -------- phase 1: conv for this batch as ONE im2col matmul ------------
        xb = x_ref[...]                                        # (Cin, H*W) f32
        r = 0
        for kh in range(KH):
            for kw in range(KW):
                off = kh * W + kw
                for ci in range(Cin):
                    # shifted flattened-spatial slice -> one im2col row
                    patches_ref[r:r + 1, :] = xb[ci:ci + 1, off:off + Q]
                    r += 1
        # (Cout, K) @ (K, Q) -> (Cout, Q), f32 accumulation on the MXU.
        acc = jnp.dot(w_ref[...], patches_ref[...],
                      preferred_element_type=jnp.float32)      # (Cout, Q)

        # Per-channel sum / sum-of-squares over VALID lanes only (single-pass
        # statistics; the wrap columns w in [Wout, W) of each row are masked out).
        lane = lax.broadcasted_iota(jnp.int32, (1, Q), 1)
        valid = (lane % W) < Wout                              # (1, Q)
        am = jnp.where(valid, acc, 0.0)
        sum_ref[...] += jnp.sum(am, axis=1, keepdims=True)     # (Cout, 1)
        ssq_ref[...] += jnp.sum(am * am, axis=1, keepdims=True)

        # Compact store of the raw conv result for this batch: drop the
        # (W - Wout) wrap columns per row, producing a lane-dense
        # (Cout, Hout*Wout) slab. Output block stays resident across the grid.
        for h in range(Hout):
            o_ref[n, :, pl.ds(h * Wout, Wout)] = acc[:, h * W:h * W + Wout]

        # -------- phase 2: fused BN + scaling epilogue on the last step --------
        @pl.when(n == pl.num_programs(0) - 1)
        def _finalize():
            mean = sum_ref[...] * inv_count                    # (Cout, 1)
            # single-pass biased variance (f32 accumulators, modest activations)
            var = ssq_ref[...] * inv_count - mean * mean
            inv_std = lax.rsqrt(var + eps_ref[0])
            g = gamma_ref[...]                                 # (Cout, 1)
            b = beta_ref[...]
            s = scale_ref[0]
            mul = (g * inv_std) * s                            # (Cout, 1)
            add = (b - mean * (g * inv_std)) * s               # (Cout, 1)
            y = o_ref[...]                                     # (N, Cout, P) raw conv
            o_ref[...] = y * mul[None] + add[None]             # one FMA-shaped pass

    return kernel, K, Q, P


def conv_bn_scale(x, conv_weight, conv_bias, bn_weight, bn_bias,
                  bn_running_mean, bn_running_var, bn_eps, bn_momentum,
                  scaling_factor):
    """NCHW in -> NCHW out, matching the PyTorch module_fn forward output."""
    # conv_bias cancels exactly under training-mode BN; running stats / momentum
    # only get side-effect updates and never touch the returned tensor.
    del conv_bias, bn_running_mean, bn_running_var, bn_momentum

    N, Cin, H, W = x.shape
    Cout, _, KH, KW = conv_weight.shape
    Hout, Wout = H - KH + 1, W - KW + 1

    kernel, K, Q, P = _make_kernel(N, Cin, H, W, Cout, KH, KW)

    # Free metadata reshape only (no activation transpose / copy).
    x_flat = x.reshape(N, Cin, H * W).astype(jnp.float32)
    # Tiny weight tensor -> (Cout, KH*KW*Cin) matching the im2col row order
    # (kh, kw, ci).  (432 elements; negligible.)
    w_mat = jnp.transpose(conv_weight, (0, 2, 3, 1)).reshape(Cout, K)
    w_mat = w_mat.astype(jnp.float32)

    out = pl.pallas_call(
        kernel,
        out_shape=jax.ShapeDtypeStruct((N, Cout, P), jnp.float32),
        grid=(N,),
        in_specs=[
            # per-batch input tile, auto double-buffered by the pipeline
            pl.BlockSpec((None, Cin, H * W), lambda n: (n, 0, 0)),
            pl.BlockSpec((Cout, K), lambda n: (0, 0)),      # weights, resident
            pl.BlockSpec((Cout, 1), lambda n: (0, 0)),      # gamma
            pl.BlockSpec((Cout, 1), lambda n: (0, 0)),      # beta
            pl.BlockSpec(memory_space=pltpu.MemorySpace.SMEM),   # eps
            pl.BlockSpec(memory_space=pltpu.MemorySpace.SMEM),   # scaling factor
        ],
        # whole output resident in VMEM across the grid (accumulator pattern),
        # written back to HBM once after the last step.
        out_specs=pl.BlockSpec((N, Cout, P), lambda n: (0, 0, 0)),
        scratch_shapes=[
            pltpu.VMEM((K, Q), jnp.float32),      # im2col patches
            pltpu.VMEM((Cout, 1), jnp.float32),   # per-channel sum
            pltpu.VMEM((Cout, 1), jnp.float32),   # per-channel sum of squares
        ],
        compiler_params=pltpu.CompilerParams(
            # single grid axis carries the BN reduction + resident output
            dimension_semantics=("arbitrary",),
        ),
    )(
        x_flat,
        w_mat,
        jnp.asarray(bn_weight, jnp.float32).reshape(Cout, 1),
        jnp.asarray(bn_bias, jnp.float32).reshape(Cout, 1),
        jnp.asarray(bn_eps, jnp.float32).reshape(1),
        jnp.asarray(scaling_factor, jnp.float32).reshape(1),
    )
    return out.reshape(N, Cout, Hout, Wout)     # free metadata reshape -> NCHW


def _reference(x_nchw, conv_w, conv_b, gamma, beta, eps, scale):
    """Pure-JAX reference mirroring F.conv2d + F.batch_norm(training) + scale."""
    y = lax.conv_general_dilated(
        x_nchw, conv_w, window_strides=(1, 1), padding="VALID",
        dimension_numbers=("NCHW", "OIHW", "NCHW"))
    y = y + conv_b[None, :, None, None]
    mean = jnp.mean(y, axis=(0, 2, 3), keepdims=True)
    var = jnp.mean((y - mean) ** 2, axis=(0, 2, 3), keepdims=True)
    y = (y - mean) * lax.rsqrt(var + eps)
    y = y * gamma[None, :, None, None] + beta[None, :, None, None]
    return y * scale


if __name__ == "__main__":
    in_channels = 3
    out_channels = 16
    kernel_size = 3
    scaling_factor = 2.0
    bn_eps = 1e-5
    bn_momentum = 0.1

    key = jax.random.PRNGKey(0)
    k1, k2, k3, k4, k5 = jax.random.split(key, 5)

    # deterministic parameters (shapes follow nn.Conv2d / nn.BatchNorm2d)
    conv_weight = jax.random.normal(
        k1, (out_channels, in_channels, kernel_size, kernel_size), jnp.float32) * 0.1
    conv_bias = jax.random.normal(k2, (out_channels,), jnp.float32) * 0.1
    bn_weight = 1.0 + jax.random.normal(k3, (out_channels,), jnp.float32) * 0.02
    bn_bias = jax.random.normal(k4, (out_channels,), jnp.float32) * 0.02
    bn_running_mean = jnp.zeros((out_channels,), jnp.float32)
    bn_running_var = jnp.ones((out_channels,), jnp.float32)

    # small input: batch=2, channels=3, spatial=16x16 (NCHW, PyTorch convention)
    x = jax.random.normal(k5, (2, in_channels, 16, 16), jnp.float32)

    out = conv_bn_scale(x, conv_weight, conv_bias, bn_weight, bn_bias,
                        bn_running_mean, bn_running_var, bn_eps, bn_momentum,
                        scaling_factor)
    out = jax.block_until_ready(out)

    ref = _reference(x, conv_weight, conv_bias, bn_weight, bn_bias,
                     bn_eps, scaling_factor)
    assert out.shape == (2, out_channels, 14, 14), out.shape
    max_err = float(jnp.max(jnp.abs(out - ref)))
    assert jnp.allclose(out, ref, rtol=1e-4, atol=5e-4), max_err
    print("KERNEL_OK")
</pallas_src>

<mosaic_0001>
module attributes {stable_mosaic.version = 11 : i64} {
  func.func @kernel(%arg0: i32, %arg1: memref<1x3x256xf32, #tpu.memory_space<vmem>>, %arg2: memref<16x27xf32, #tpu.memory_space<vmem>>, %arg3: memref<16x1xf32, #tpu.memory_space<vmem>>, %arg4: memref<16x1xf32, #tpu.memory_space<vmem>>, %arg5: memref<1xf32, #tpu.memory_space<smem>>, %arg6: memref<1xf32, #tpu.memory_space<smem>>, %arg7: memref<2x16x196xf32, #tpu.memory_space<vmem>>, %arg8: memref<27x222xf32, #tpu.memory_space<vmem>>, %arg9: memref<16x1xf32, #tpu.memory_space<vmem>>, %arg10: memref<16x1xf32, #tpu.memory_space<vmem>>) attributes {dimension_semantics = [#tpu.dimension_semantics<arbitrary>], iteration_bounds = array<i64: 2>, scalar_prefetch = 0 : i64, scratch_operands = 3 : i64, tpu.core_type = #tpu.core_type<tc>, window_params = [{transform_indices = @transform_0, window_bounds = array<i64: 1, 3, 256>}, {pipeline_mode = #tpu.pipeline_mode<synchronous>, transform_indices = @transform_1, window_bounds = array<i64: 16, 27>}, {pipeline_mode = #tpu.pipeline_mode<synchronous>, transform_indices = @transform_2, window_bounds = array<i64: 16, 1>}, {pipeline_mode = #tpu.pipeline_mode<synchronous>, transform_indices = @transform_3, window_bounds = array<i64: 16, 1>}, {transform_indices = @transform_4, window_bounds = array<i64: 1>}, {transform_indices = @transform_5, window_bounds = array<i64: 1>}, {pipeline_mode = #tpu.pipeline_mode<synchronous>, transform_indices = @transform_6, window_bounds = array<i64: 2, 16, 196>}]} {
    %c0_i32 = arith.constant 0 : i32
    %0 = arith.cmpi eq, %arg0, %c0_i32 : i32
    %1 = arith.extui %0 : i1 to i32
    %c0_i32_0 = arith.constant 0 : i32
    %2 = arith.cmpi ne, %1, %c0_i32_0 : i32
    scf.if %2 {
      %cst_68 = arith.constant 0.000000e+00 : f32
      %169 = vector.broadcast %cst_68 : f32 to vector<16x1xf32>
      %c0_69 = arith.constant 0 : index
      %c0_70 = arith.constant 0 : index
      %170 = vector.load %arg9[%c0_69, %c0_70] : memref<16x1xf32, #tpu.memory_space<vmem>>, vector<16x1xf32>
      tpu.vector_store %arg9[%c0_69, %c0_70], %169 {strides = array<i32>} : memref<16x1xf32, #tpu.memory_space<vmem>>, vector<16x1xf32>,
      %cst_71 = arith.constant 0.000000e+00 : f32
      %171 = vector.broadcast %cst_71 : f32 to vector<16x1xf32>
      %c0_72 = arith.constant 0 : index
      %c0_73 = arith.constant 0 : index
      %172 = vector.load %arg10[%c0_72, %c0_73] : memref<16x1xf32, #tpu.memory_space<vmem>>, vector<16x1xf32>
      tpu.vector_store %arg10[%c0_72, %c0_73], %171 {strides = array<i32>} : memref<16x1xf32, #tpu.memory_space<vmem>>, vector<16x1xf32>,
    } else {
    }
    %c0 = arith.constant 0 : index
    %c0_1 = arith.constant 0 : index
    %c0_2 = arith.constant 0 : index
    %3 = vector.load %arg1[%c0, %c0_1, %c0_2] : memref<1x3x256xf32, #tpu.memory_space<vmem>>, vector<1x3x256xf32>
    %4 = vector.shape_cast %3 : vector<1x3x256xf32> to vector<3x256xf32>
    %5 = vector.extract_strided_slice %4 {offsets = [0, 0], sizes = [1, 222], strides = [1, 1]} : vector<3x256xf32> to vector<1x222xf32>
    %c0_3 = arith.constant 0 : index
    %c0_4 = arith.constant 0 : index
    %6 = vector.load %arg8[%c0_3, %c0_4] : memref<27x222xf32, #tpu.memory_space<vmem>>, vector<1x222xf32>
    tpu.vector_store %arg8[%c0_3, %c0_4], %5 {strides = array<i32>} : memref<27x222xf32, #tpu.memory_space<vmem>>, vector<1x222xf32>,
    %7 = vector.extract_strided_slice %4 {offsets = [1, 0], sizes = [1, 222], strides = [1, 1]} : vector<3x256xf32> to vector<1x222xf32>
    %c1 = arith.constant 1 : index
    %c0_5 = arith.constant 0 : index
    %8 = vector.load %arg8[%c1, %c0_5] : memref<27x222xf32, #tpu.memory_space<vmem>>, vector<1x222xf32>
    tpu.vector_store %arg8[%c1, %c0_5], %7 {strides = array<i32>} : memref<27x222xf32, #tpu.memory_space<vmem>>, vector<1x222xf32>,
    %9 = vector.extract_strided_slice %4 {offsets = [2, 0], sizes = [1, 222], strides = [1, 1]} : vector<3x256xf32> to vector<1x222xf32>
    %c2 = arith.constant 2 : index
    %c0_6 = arith.constant 0 : index
    %10 = vector.load %arg8[%c2, %c0_6] : memref<27x222xf32, #tpu.memory_space<vmem>>, vector<1x222xf32>
    tpu.vector_store %arg8[%c2, %c0_6], %9 {strides = array<i32>} : memref<27x222xf32, #tpu.memory_space<vmem>>, vector<1x222xf32>,
    %11 = vector.extract_strided_slice %4 {offsets = [0, 1], sizes = [1, 222], strides = [1, 1]} : vector<3x256xf32> to vector<1x222xf32>
    %c3 = arith.constant 3 : index
    %c0_7 = arith.constant 0 : index
    %12 = vector.load %arg8[%c3, %c0_7] : memref<27x222xf32, #tpu.memory_space<vmem>>, vector<1x222xf32>
    tpu.vector_store %arg8[%c3, %c0_7], %11 {strides = array<i32>} : memref<27x222xf32, #tpu.memory_space<vmem>>, vector<1x222xf32>,
    %13 = vector.extract_strided_slice %4 {offsets = [1, 1], sizes = [1, 222], strides = [1, 1]} : vector<3x256xf32> to vector<1x222xf32>
    %c4 = arith.constant 4 : index
    %c0_8 = arith.constant 0 : index
    %14 = vector.load %arg8[%c4, %c0_8] : memref<27x222xf32, #tpu.memory_space<vmem>>, vector<1x222xf32>
    tpu.vector_store %arg8[%c4, %c0_8], %13 {strides = array<i32>} : memref<27x222xf32, #tpu.memory_space<vmem>>, vector<1x222xf32>,
    %15 = vector.extract_strided_slice %4 {offsets = [2, 1], sizes = [1, 222], strides = [1, 1]} : vector<3x256xf32> to vector<1x222xf32>
    %c5 = arith.constant 5 : index
    %c0_9 = arith.constant 0 : index
    %16 = vector.load %arg8[%c5, %c0_9] : memref<27x222xf32, #tpu.memory_space<vmem>>, vector<1x222xf32>
    tpu.vector_store %arg8[%c5, %c0_9], %15 {strides = array<i32>} : memref<27x222xf32, #tpu.memory_space<vmem>>, vector<1x222xf32>,
    %17 = vector.extract_strided_slice %4 {offsets = [0, 2], sizes = [1, 222], strides = [1, 1]} : vector<3x256xf32> to vector<1x222xf32>
    %c6 = arith.constant 6 : index
    %c0_10 = arith.constant 0 : index
    %18 = vector.load %arg8[%c6, %c0_10] : memref<27x222xf32, #tpu.memory_space<vmem>>, vector<1x222xf32>
    tpu.vector_store %arg8[%c6, %c0_10], %17 {strides = array<i32>} : memref<27x222xf32, #tpu.memory_space<vmem>>, vector<1x222xf32>,
    %19 = vector.extract_strided_slice %4 {offsets = [1, 2], sizes = [1, 222], strides = [1, 1]} : vector<3x256xf32> to vector<1x222xf32>
    %c7 = arith.constant 7 : index
    %c0_11 = arith.constant 0 : index
    %20 = vector.load %arg8[%c7, %c0_11] : memref<27x222xf32, #tpu.memory_space<vmem>>, vector<1x222xf32>
    tpu.vector_store %arg8[%c7, %c0_11], %19 {strides = array<i32>} : memref<27x222xf32, #tpu.memory_space<vmem>>, vector<1x222xf32>,
    %21 = vector.extract_strided_slice %4 {offsets = [2, 2], sizes = [1, 222], strides = [1, 1]} : vector<3x256xf32> to vector<1x222xf32>
    %c8 = arith.constant 8 : index
    %c0_12 = arith.constant 0 : index
    %22 = vector.load %arg8[%c8, %c0_12] : memref<27x222xf32, #tpu.memory_space<vmem>>, vector<1x222xf32>
    tpu.vector_store %arg8[%c8, %c0_12], %21 {strides = array<i32>} : memref<27x222xf32, #tpu.memory_space<vmem>>, vector<1x222xf32>,
    %23 = vector.extract_strided_slice %4 {offsets = [0, 16], sizes = [1, 222], strides = [1, 1]} : vector<3x256xf32> to vector<1x222xf32>
    %c9 = arith.constant 9 : index
    %c0_13 = arith.constant 0 : index
    %24 = vector.load %arg8[%c9, %c0_13] : memref<27x222xf32, #tpu.memory_space<vmem>>, vector<1x222xf32>
    tpu.vector_store %arg8[%c9, %c0_13], %23 {strides = array<i32>} : memref<27x222xf32, #tpu.memory_space<vmem>>, vector<1x222xf32>,
    %25 = vector.extract_strided_slice %4 {offsets = [1, 16], sizes = [1, 222], strides = [1, 1]} : vector<3x256xf32> to vector<1x222xf32>
    %c10 = arith.constant 10 : index
    %c0_14 = arith.constant 0 : index
    %26 = vector.load %arg8[%c10, %c0_14] : memref<27x222xf32, #tpu.memory_space<vmem>>, vector<1x222xf32>
    tpu.vector_store %arg8[%c10, %c0_14], %25 {strides = array<i32>} : memref<27x222xf32, #tpu.memory_space<vmem>>, vector<1x222xf32>,
    %27 = vector.extract_strided_slice %4 {offsets = [2, 16], sizes = [1, 222], strides = [1, 1]} : vector<3x256xf32> to vector<1x222xf32>
    %c11 = arith.constant 11 : index
    %c0_15 = arith.constant 0 : index
    %28 = vector.load %arg8[%c11, %c0_15] : memref<27x222xf32, #tpu.memory_space<vmem>>, vector<1x222xf32>
    tpu.vector_store %arg8[%c11, %c0_15], %27 {strides = array<i32>} : memref<27x222xf32, #tpu.memory_space<vmem>>, vector<1x222xf32>,
    %29 = vector.extract_strided_slice %4 {offsets = [0, 17], sizes = [1, 222], strides = [1, 1]} : vector<3x256xf32> to vector<1x222xf32>
    %c12 = arith.constant 12 : index
    %c0_16 = arith.constant 0 : index
    %30 = vector.load %arg8[%c12, %c0_16] : memref<27x222xf32, #tpu.memory_space<vmem>>, vector<1x222xf32>
    tpu.vector_store %arg8[%c12, %c0_16], %29 {strides = array<i32>} : memref<27x222xf32, #tpu.memory_space<vmem>>, vector<1x222xf32>,
    %31 = vector.extract_strided_slice %4 {offsets = [1, 17], sizes = [1, 222], strides = [1, 1]} : vector<3x256xf32> to vector<1x222xf32>
    %c13 = arith.constant 13 : index
    %c0_17 = arith.constant 0 : index
    %32 = vector.load %arg8[%c13, %c0_17] : memref<27x222xf32, #tpu.memory_space<vmem>>, vector<1x222xf32>
    tpu.vector_store %arg8[%c13, %c0_17], %31 {strides = array<i32>} : memref<27x222xf32, #tpu.memory_space<vmem>>, vector<1x222xf32>,
    %33 = vector.extract_strided_slice %4 {offsets = [2, 17], sizes = [1, 222], strides = [1, 1]} : vector<3x256xf32> to vector<1x222xf32>
    %c14 = arith.constant 14 : index
    %c0_18 = arith.constant 0 : index
    %34 = vector.load %arg8[%c14, %c0_18] : memref<27x222xf32, #tpu.memory_space<vmem>>, vector<1x222xf32>
    tpu.vector_store %arg8[%c14, %c0_18], %33 {strides = array<i32>} : memref<27x222xf32, #tpu.memory_space<vmem>>, vector<1x222xf32>,
    %35 = vector.extract_strided_slice %4 {offsets = [0, 18], sizes = [1, 222], strides = [1, 1]} : vector<3x256xf32> to vector<1x222xf32>
    %c15 = arith.constant 15 : index
    %c0_19 = arith.constant 0 : index
    %36 = vector.load %arg8[%c15, %c0_19] : memref<27x222xf32, #tpu.memory_space<vmem>>, vector<1x222xf32>
    tpu.vector_store %arg8[%c15, %c0_19], %35 {strides = array<i32>} : memref<27x222xf32, #tpu.memory_space<vmem>>, vector<1x222xf32>,
    %37 = vector.extract_strided_slice %4 {offsets = [1, 18], sizes = [1, 222], strides = [1, 1]} : vector<3x256xf32> to vector<1x222xf32>
    %c16 = arith.constant 16 : index
    %c0_20 = arith.constant 0 : index
    %38 = vector.load %arg8[%c16, %c0_20] : memref<27x222xf32, #tpu.memory_space<vmem>>, vector<1x222xf32>
    tpu.vector_store %arg8[%c16, %c0_20], %37 {strides = array<i32>} : memref<27x222xf32, #tpu.memory_space<vmem>>, vector<1x222xf32>,
    %39 = vector.extract_strided_slice %4 {offsets = [2, 18], sizes = [1, 222], strides = [1, 1]} : vector<3x256xf32> to vector<1x222xf32>
    %c17 = arith.constant 17 : index
    %c0_21 = arith.constant 0 : index
    %40 = vector.load %arg8[%c17, %c0_21] : memref<27x222xf32, #tpu.memory_space<vmem>>, vector<1x222xf32>
    tpu.vector_store %arg8[%c17, %c0_21], %39 {strides = array<i32>} : memref<27x222xf32, #tpu.memory_space<vmem>>, vector<1x222xf32>,
    %41 = vector.extract_strided_slice %4 {offsets = [0, 32], sizes = [1, 222], strides = [1, 1]} : vector<3x256xf32> to vector<1x222xf32>
    %c18 = arith.constant 18 : index
    %c0_22 = arith.constant 0 : index
    %42 = vector.load %arg8[%c18, %c0_22] : memref<27x222xf32, #tpu.memory_space<vmem>>, vector<1x222xf32>
    tpu.vector_store %arg8[%c18, %c0_22], %41 {strides = array<i32>} : memref<27x222xf32, #tpu.memory_space<vmem>>, vector<1x222xf32>,
    %43 = vector.extract_strided_slice %4 {offsets = [1, 32], sizes = [1, 222], strides = [1, 1]} : vector<3x256xf32> to vector<1x222xf32>
    %c19 = arith.constant 19 : index
    %c0_23 = arith.constant 0 : index
    %44 = vector.load %arg8[%c19, %c0_23] : memref<27x222xf32, #tpu.memory_space<vmem>>, vector<1x222xf32>
    tpu.vector_store %arg8[%c19, %c0_23], %43 {strides = array<i32>} : memref<27x222xf32, #tpu.memory_space<vmem>>, vector<1x222xf32>,
    %45 = vector.extract_strided_slice %4 {offsets = [2, 32], sizes = [1, 222], strides = [1, 1]} : vector<3x256xf32> to vector<1x222xf32>
    %c20 = arith.constant 20 : index
    %c0_24 = arith.constant 0 : index
    %46 = vector.load %arg8[%c20, %c0_24] : memref<27x222xf32, #tpu.memory_space<vmem>>, vector<1x222xf32>
    tpu.vector_store %arg8[%c20, %c0_24], %45 {strides = array<i32>} : memref<27x222xf32, #tpu.memory_space<vmem>>, vector<1x222xf32>,
    %47 = vector.extract_strided_slice %4 {offsets = [0, 33], sizes = [1, 222], strides = [1, 1]} : vector<3x256xf32> to vector<1x222xf32>
    %c21 = arith.constant 21 : index
    %c0_25 = arith.constant 0 : index
    %48 = vector.load %arg8[%c21, %c0_25] : memref<27x222xf32, #tpu.memory_space<vmem>>, vector<1x222xf32>
    tpu.vector_store %arg8[%c21, %c0_25], %47 {strides = array<i32>} : memref<27x222xf32, #tpu.memory_space<vmem>>, vector<1x222xf32>,
    %49 = vector.extract_strided_slice %4 {offsets = [1, 33], sizes = [1, 222], strides = [1, 1]} : vector<3x256xf32> to vector<1x222xf32>
    %c22 = arith.constant 22 : index
    %c0_26 = arith.constant 0 : index
    %50 = vector.load %arg8[%c22, %c0_26] : memref<27x222xf32, #tpu.memory_space<vmem>>, vector<1x222xf32>
    tpu.vector_store %arg8[%c22, %c0_26], %49 {strides = array<i32>} : memref<27x222xf32, #tpu.memory_space<vmem>>, vector<1x222xf32>,
    %51 = vector.extract_strided_slice %4 {offsets = [2, 33], sizes = [1, 222], strides = [1, 1]} : vector<3x256xf32> to vector<1x222xf32>
    %c23 = arith.constant 23 : index
    %c0_27 = arith.constant 0 : index
    %52 = vector.load %arg8[%c23, %c0_27] : memref<27x222xf32, #tpu.memory_space<vmem>>, vector<1x222xf32>
    tpu.vector_store %arg8[%c23, %c0_27], %51 {strides = array<i32>} : memref<27x222xf32, #tpu.memory_space<vmem>>, vector<1x222xf32>,
    %53 = vector.extract_strided_slice %4 {offsets = [0, 34], sizes = [1, 222], strides = [1, 1]} : vector<3x256xf32> to vector<1x222xf32>
    %c24 = arith.constant 24 : index
    %c0_28 = arith.constant 0 : index
    %54 = vector.load %arg8[%c24, %c0_28] : memref<27x222xf32, #tpu.memory_space<vmem>>, vector<1x222xf32>
    tpu.vector_store %arg8[%c24, %c0_28], %53 {strides = array<i32>} : memref<27x222xf32, #tpu.memory_space<vmem>>, vector<1x222xf32>,
    %55 = vector.extract_strided_slice %4 {offsets = [1, 34], sizes = [1, 222], strides = [1, 1]} : vector<3x256xf32> to vector<1x222xf32>
    %c25 = arith.constant 25 : index
    %c0_29 = arith.constant 0 : index
    %56 = vector.load %arg8[%c25, %c0_29] : memref<27x222xf32, #tpu.memory_space<vmem>>, vector<1x222xf32>
    tpu.vector_store %arg8[%c25, %c0_29], %55 {strides = array<i32>} : memref<27x222xf32, #tpu.memory_space<vmem>>, vector<1x222xf32>,
    %57 = vector.extract_strided_slice %4 {offsets = [2, 34], sizes = [1, 222], strides = [1, 1]} : vector<3x256xf32> to vector<1x222xf32>
    %c26 = arith.constant 26 : index
    %c0_30 = arith.constant 0 : index
    %58 = vector.load %arg8[%c26, %c0_30] : memref<27x222xf32, #tpu.memory_space<vmem>>, vector<1x222xf32>
    tpu.vector_store %arg8[%c26, %c0_30], %57 {strides = array<i32>} : memref<27x222xf32, #tpu.memory_space<vmem>>, vector<1x222xf32>,
    %c0_31 = arith.constant 0 : index
    %c0_32 = arith.constant 0 : index
    %59 = vector.load %arg2[%c0_31, %c0_32] : memref<16x27xf32, #tpu.memory_space<vmem>>, vector<16x27xf32>
    %c0_33 = arith.constant 0 : index
    %c0_34 = arith.constant 0 : index
    %60 = vector.load %arg8[%c0_33, %c0_34] : memref<27x222xf32, #tpu.memory_space<vmem>>, vector<27x222xf32>
    %cst = arith.constant dense<0.000000e+00> : vector<16x222xf32>
    %61 = tpu.matmul %59, %60, %cst {dimension_numbers = #tpu.dot_dimension_numbers<[1], [0], [0], [1], [0, 0, 1, 1], [], []>} : vector<16x27xf32>, vector<27x222xf32>, vector<16x222xf32> -> vector<16x222xf32>
    %62 = tpu.iota {dimensions = array<i32: 1>} : vector<1x222xi32>
    %c16_i32 = arith.constant 16 : i32
    %c0_i32_35 = arith.constant 0 : i32
    %63 = arith.cmpi eq, %c16_i32, %c0_i32_35 : i32
    %c1_i32 = arith.constant 1 : i32
    %64 = arith.select %63, %c1_i32, %c16_i32 : i32
    %65 = vector.broadcast %64 : i32 to vector<1x222xi32>
    %66 = arith.remsi %62, %65 : vector<1x222xi32>
    %c0_i32_36 = arith.constant 0 : i32
    %67 = vector.broadcast %c0_i32_36 : i32 to vector<1x222xi32>
    %68 = arith.cmpi ne, %66, %67 : vector<1x222xi32>
    %c0_i32_37 = arith.constant 0 : i32
    %69 = vector.broadcast %c0_i32_37 : i32 to vector<1x222xi32>
    %70 = arith.cmpi slt, %66, %69 : vector<1x222xi32>
    %c0_i32_38 = arith.constant 0 : i32
    %71 = arith.cmpi slt, %64, %c0_i32_38 : i32
    %72 = vector.broadcast %71 : i1 to vector<1x222xi1>
    %73 = vector.broadcast %72 : vector<1x222xi1> to vector<1x222xi1>
    %74 = arith.xori %70, %73 : vector<1x222xi1>
    %75 = arith.andi %74, %68 : vector<1x222xi1>
    %76 = vector.broadcast %64 : i32 to vector<1x222xi32>
    %77 = arith.addi %66, %76 : vector<1x222xi32>
    %78 = arith.select %75, %77, %66 : vector<1x222xi1>, vector<1x222xi32>
    %c14_i32 = arith.constant 14 : i32
    %79 = vector.broadcast %c14_i32 : i32 to vector<1x222xi32>
    %80 = arith.cmpi slt, %78, %79 : vector<1x222xi32>
    %cst_39 = arith.constant 0.000000e+00 : f32
    %81 = vector.shape_cast %80 : vector<1x222xi1> to vector<1x222xi1>
    %82 = vector.broadcast %81 : vector<1x222xi1> to vector<16x222xi1>
    %83 = vector.broadcast %cst_39 : f32 to vector<16x222xf32>
    %84 = arith.select %82, %61, %83 : vector<16x222xi1>, vector<16x222xf32>
    %c0_40 = arith.constant 0 : index
    %c0_41 = arith.constant 0 : index
    %85 = vector.load %arg9[%c0_40, %c0_41] : memref<16x1xf32, #tpu.memory_space<vmem>>, vector<16x1xf32>
    %cst_42 = arith.constant dense<0.000000e+00> : vector<16xf32>
    %86 = vector.multi_reduction <add>, %84, %cst_42 [1] : vector<16x222xf32> to vector<16xf32>
    %87 = vector.shape_cast %86 : vector<16xf32> to vector<16x1xf32>
    %88 = arith.addf %85, %87 : vector<16x1xf32>
    %c0_43 = arith.constant 0 : index
    %c0_44 = arith.constant 0 : index
    %89 = vector.load %arg9[%c0_43, %c0_44] : memref<16x1xf32, #tpu.memory_space<vmem>>, vector<16x1xf32>
    tpu.vector_store %arg9[%c0_43, %c0_44], %88 {strides = array<i32>} : memref<16x1xf32, #tpu.memory_space<vmem>>, vector<16x1xf32>,
    %c0_45 = arith.constant 0 : index
    %c0_46 = arith.constant 0 : index
    %90 = vector.load %arg10[%c0_45, %c0_46] : memref<16x1xf32, #tpu.memory_space<vmem>>, vector<16x1xf32>
    %91 = arith.mulf %84, %84 : vector<16x222xf32>
    %cst_47 = arith.constant dense<0.000000e+00> : vector<16xf32>
    %92 = vector.multi_reduction <add>, %91, %cst_47 [1] : vector<16x222xf32> to vector<16xf32>
    %93 = vector.shape_cast %92 : vector<16xf32> to vector<16x1xf32>
    %94 = arith.addf %90, %93 : vector<16x1xf32>
    %c0_48 = arith.constant 0 : index
    %c0_49 = arith.constant 0 : index
    %95 = vector.load %arg10[%c0_48, %c0_49] : memref<16x1xf32, #tpu.memory_space<vmem>>, vector<16x1xf32>
    tpu.vector_store %arg10[%c0_48, %c0_49], %94 {strides = array<i32>} : memref<16x1xf32, #tpu.memory_space<vmem>>, vector<16x1xf32>,
    %96 = vector.extract_strided_slice %61 {offsets = [0, 0], sizes = [16, 14], strides = [1, 1]} : vector<16x222xf32> to vector<16x14xf32>
    %97 = arith.index_cast %arg0 : i32 to index
    %c0_50 = arith.constant 0 : index
    %c0_51 = arith.constant 0 : index
    %98 = vector.load %arg7[%97, %c0_50, %c0_51] : memref<2x16x196xf32, #tpu.memory_space<vmem>>, vector<1x16x14xf32>
    %99 = vector.shape_cast %98 : vector<1x16x14xf32> to vector<16x14xf32>
    %100 = vector.shape_cast %96 : vector<16x14xf32> to vector<1x16x14xf32>
    tpu.vector_store %arg7[%97, %c0_50, %c0_51], %100 {strides = array<i32>} : memref<2x16x196xf32, #tpu.memory_space<vmem>>, vector<1x16x14xf32>,
    %101 = vector.extract_strided_slice %61 {offsets = [0, 16], sizes = [16, 14], strides = [1, 1]} : vector<16x222xf32> to vector<16x14xf32>
    %102 = arith.index_cast %arg0 : i32 to index
    %c0_52 = arith.constant 0 : index
    %c14_53 = arith.constant 14 : index
    %103 = vector.load %arg7[%102, %c0_52, %c14_53] : memref<2x16x196xf32, #tpu.memory_space<vmem>>, vector<1x16x14xf32>
    %104 = vector.shape_cast %103 : vector<1x16x14xf32> to vector<16x14xf32>
    %105 = vector.shape_cast %101 : vector<16x14xf32> to vector<1x16x14xf32>
    tpu.vector_store %arg7[%102, %c0_52, %c14_53], %105 {strides = array<i32>} : memref<2x16x196xf32, #tpu.memory_space<vmem>>, vector<1x16x14xf32>,
    %106 = vector.extract_strided_slice %61 {offsets = [0, 32], sizes = [16, 14], strides = [1, 1]} : vector<16x222xf32> to vector<16x14xf32>
    %107 = arith.index_cast %arg0 : i32 to index
    %c0_54 = arith.constant 0 : index
    %c28 = arith.constant 28 : index
    %108 = vector.load %arg7[%107, %c0_54, %c28] : memref<2x16x196xf32, #tpu.memory_space<vmem>>, vector<1x16x14xf32>
    %109 = vector.shape_cast %108 : vector<1x16x14xf32> to vector<16x14xf32>
    %110 = vector.shape_cast %106 : vector<16x14xf32> to vector<1x16x14xf32>
    tpu.vector_store %arg7[%107, %c0_54, %c28], %110 {strides = array<i32>} : memref<2x16x196xf32, #tpu.memory_space<vmem>>, vector<1x16x14xf32>,
    %111 = vector.extract_strided_slice %61 {offsets = [0, 48], sizes = [16, 14], strides = [1, 1]} : vector<16x222xf32> to vector<16x14xf32>
    %112 = arith.index_cast %arg0 : i32 to index
    %c0_55 = arith.constant 0 : index
    %c42 = arith.constant 42 : index
    %113 = vector.load %arg7[%112, %c0_55, %c42] : memref<2x16x196xf32, #tpu.memory_space<vmem>>, vector<1x16x14xf32>
    %114 = vector.shape_cast %113 : vector<1x16x14xf32> to vector<16x14xf32>
    %115 = vector.shape_cast %111 : vector<16x14xf32> to vector<1x16x14xf32>
    tpu.vector_store %arg7[%112, %c0_55, %c42], %115 {strides = array<i32>} : memref<2x16x196xf32, #tpu.memory_space<vmem>>, vector<1x16x14xf32>,
    %116 = vector.extract_strided_slice %61 {offsets = [0, 64], sizes = [16, 14], strides = [1, 1]} : vector<16x222xf32> to vector<16x14xf32>
    %117 = arith.index_cast %arg0 : i32 to index
    %c0_56 = arith.constant 0 : index
    %c56 = arith.constant 56 : index
    %118 = vector.load %arg7[%117, %c0_56, %c56] : memref<2x16x196xf32, #tpu.memory_space<vmem>>, vector<1x16x14xf32>
    %119 = vector.shape_cast %118 : vector<1x16x14xf32> to vector<16x14xf32>
    %120 = vector.shape_cast %116 : vector<16x14xf32> to vector<1x16x14xf32>
    tpu.vector_store %arg7[%117, %c0_56, %c56], %120 {strides = array<i32>} : memref<2x16x196xf32, #tpu.memory_space<vmem>>, vector<1x16x14xf32>,
    %121 = vector.extract_strided_slice %61 {offsets = [0, 80], sizes = [16, 14], strides = [1, 1]} : vector<16x222xf32> to vector<16x14xf32>
    %122 = arith.index_cast %arg0 : i32 to index
    %c0_57 = arith.constant 0 : index
    %c70 = arith.constant 70 : index
    %123 = vector.load %arg7[%122, %c0_57, %c70] : memref<2x16x196xf32, #tpu.memory_space<vmem>>, vector<1x16x14xf32>
    %124 = vector.shape_cast %123 : vector<1x16x14xf32> to vector<16x14xf32>
    %125 = vector.shape_cast %121 : vector<16x14xf32> to vector<1x16x14xf32>
    tpu.vector_store %arg7[%122, %c0_57, %c70], %125 {strides = array<i32>} : memref<2x16x196xf32, #tpu.memory_space<vmem>>, vector<1x16x14xf32>,
    %126 = vector.extract_strided_slice %61 {offsets = [0, 96], sizes = [16, 14], strides = [1, 1]} : vector<16x222xf32> to vector<16x14xf32>
    %127 = arith.index_cast %arg0 : i32 to index
    %c0_58 = arith.constant 0 : index
    %c84 = arith.constant 84 : index
    %128 = vector.load %arg7[%127, %c0_58, %c84] : memref<2x16x196xf32, #tpu.memory_space<vmem>>, vector<1x16x14xf32>
    %129 = vector.shape_cast %128 : vector<1x16x14xf32> to vector<16x14xf32>
    %130 = vector.shape_cast %126 : vector<16x14xf32> to vector<1x16x14xf32>
    tpu.vector_store %arg7[%127, %c0_58, %c84], %130 {strides = array<i32>} : memref<2x16x196xf32, #tpu.memory_space<vmem>>, vector<1x16x14xf32>,
    %131 = vector.extract_strided_slice %61 {offsets = [0, 112], sizes = [16, 14], strides = [1, 1]} : vector<16x222xf32> to vector<16x14xf32>
    %132 = arith.index_cast %arg0 : i32 to index
    %c0_59 = arith.constant 0 : index
    %c98 = arith.constant 98 : index
    %133 = vector.load %arg7[%132, %c0_59, %c98] : memref<2x16x196xf32, #tpu.memory_space<vmem>>, vector<1x16x14xf32>
    %134 = vector.shape_cast %133 : vector<1x16x14xf32> to vector<16x14xf32>
    %135 = vector.shape_cast %131 : vector<16x14xf32> to vector<1x16x14xf32>
    tpu.vector_store %arg7[%132, %c0_59, %c98], %135 {strides = array<i32>} : memref<2x16x196xf32, #tpu.memory_space<vmem>>, vector<1x16x14xf32>,
    %136 = vector.extract_strided_slice %61 {offsets = [0, 128], sizes = [16, 14], strides = [1, 1]} : vector<16x222xf32> to vector<16x14xf32>
    %137 = arith.index_cast %arg0 : i32 to index
    %c0_60 = arith.constant 0 : index
    %c112 = arith.constant 112 : index
    %138 = vector.load %arg7[%137, %c0_60, %c112] : memref<2x16x196xf32, #tpu.memory_space<vmem>>, vector<1x16x14xf32>
    %139 = vector.shape_cast %138 : vector<1x16x14xf32> to vector<16x14xf32>
    %140 = vector.shape_cast %136 : vector<16x14xf32> to vector<1x16x14xf32>
    tpu.vector_store %arg7[%137, %c0_60, %c112], %140 {strides = array<i32>} : memref<2x16x196xf32, #tpu.memory_space<vmem>>, vector<1x16x14xf32>,
    %141 = vector.extract_strided_slice %61 {offsets = [0, 144], sizes = [16, 14], strides = [1, 1]} : vector<16x222xf32> to vector<16x14xf32>
    %142 = arith.index_cast %arg0 : i32 to index
    %c0_61 = arith.constant 0 : index
    %c126 = arith.constant 126 : index
    %143 = vector.load %arg7[%142, %c0_61, %c126] : memref<2x16x196xf32, #tpu.memory_space<vmem>>, vector<1x16x14xf32>
    %144 = vector.shape_cast %143 : vector<1x16x14xf32> to vector<16x14xf32>
    %145 = vector.shape_cast %141 : vector<16x14xf32> to vector<1x16x14xf32>
    tpu.vector_store %arg7[%142, %c0_61, %c126], %145 {strides = array<i32>} : memref<2x16x196xf32, #tpu.memory_space<vmem>>, vector<1x16x14xf32>,
    %146 = vector.extract_strided_slice %61 {offsets = [0, 160], sizes = [16, 14], strides = [1, 1]} : vector<16x222xf32> to vector<16x14xf32>
    %147 = arith.index_cast %arg0 : i32 to index
    %c0_62 = arith.constant 0 : index
    %c140 = arith.constant 140 : index
    %148 = vector.load %arg7[%147, %c0_62, %c140] : memref<2x16x196xf32, #tpu.memory_space<vmem>>, vector<1x16x14xf32>
    %149 = vector.shape_cast %148 : vector<1x16x14xf32> to vector<16x14xf32>
    %150 = vector.shape_cast %146 : vector<16x14xf32> to vector<1x16x14xf32>
    tpu.vector_store %arg7[%147, %c0_62, %c140], %150 {strides = array<i32>} : memref<2x16x196xf32, #tpu.memory_space<vmem>>, vector<1x16x14xf32>,
    %151 = vector.extract_strided_slice %61 {offsets = [0, 176], sizes = [16, 14], strides = [1, 1]} : vector<16x222xf32> to vector<16x14xf32>
    %152 = arith.index_cast %arg0 : i32 to index
    %c0_63 = arith.constant 0 : index
    %c154 = arith.constant 154 : index
    %153 = vector.load %arg7[%152, %c0_63, %c154] : memref<2x16x196xf32, #tpu.memory_space<vmem>>, vector<1x16x14xf32>
    %154 = vector.shape_cast %153 : vector<1x16x14xf32> to vector<16x14xf32>
    %155 = vector.shape_cast %151 : vector<16x14xf32> to vector<1x16x14xf32>
    tpu.vector_store %arg7[%152, %c0_63, %c154], %155 {strides = array<i32>} : memref<2x16x196xf32, #tpu.memory_space<vmem>>, vector<1x16x14xf32>,
    %156 = vector.extract_strided_slice %61 {offsets = [0, 192], sizes = [16, 14], strides = [1, 1]} : vector<16x222xf32> to vector<16x14xf32>
    %157 = arith.index_cast %arg0 : i32 to index
    %c0_64 = arith.constant 0 : index
    %c168 = arith.constant 168 : index
    %158 = vector.load %arg7[%157, %c0_64, %c168] : memref<2x16x196xf32, #tpu.memory_space<vmem>>, vector<1x16x14xf32>
    %159 = vector.shape_cast %158 : vector<1x16x14xf32> to vector<16x14xf32>
    %160 = vector.shape_cast %156 : vector<16x14xf32> to vector<1x16x14xf32>
    tpu.vector_store %arg7[%157, %c0_64, %c168], %160 {strides = array<i32>} : memref<2x16x196xf32, #tpu.memory_space<vmem>>, vector<1x16x14xf32>,
    %161 = vector.extract_strided_slice %61 {offsets = [0, 208], sizes = [16, 14], strides = [1, 1]} : vector<16x222xf32> to vector<16x14xf32>
    %162 = arith.index_cast %arg0 : i32 to index
    %c0_65 = arith.constant 0 : index
    %c182 = arith.constant 182 : index
    %163 = vector.load %arg7[%162, %c0_65, %c182] : memref<2x16x196xf32, #tpu.memory_space<vmem>>, vector<1x16x14xf32>
    %164 = vector.shape_cast %163 : vector<1x16x14xf32> to vector<16x14xf32>
    %165 = vector.shape_cast %161 : vector<16x14xf32> to vector<1x16x14xf32>
    tpu.vector_store %arg7[%162, %c0_65, %c182], %165 {strides = array<i32>} : memref<2x16x196xf32, #tpu.memory_space<vmem>>, vector<1x16x14xf32>,
    %c1_i32_66 = arith.constant 1 : i32
    %166 = arith.cmpi eq, %arg0, %c1_i32_66 : i32
    %167 = arith.extui %166 : i1 to i32
    %c0_i32_67 = arith.constant 0 : i32
    %168 = arith.cmpi ne, %167, %c0_i32_67 : i32
    scf.if %168 {
      %c0_68 = arith.constant 0 : index
      %c0_69 = arith.constant 0 : index
      %169 = vector.load %arg9[%c0_68, %c0_69] : memref<16x1xf32, #tpu.memory_space<vmem>>, vector<16x1xf32>
      %cst_70 = arith.constant 0.00255102036 : f32
      %170 = vector.broadcast %cst_70 : f32 to vector<16x1xf32>
      %171 = arith.mulf %169, %170 : vector<16x1xf32>
      %c0_71 = arith.constant 0 : index
      %c0_72 = arith.constant 0 : index
      %172 = vector.load %arg10[%c0_71, %c0_72] : memref<16x1xf32, #tpu.memory_space<vmem>>, vector<16x1xf32>
      %cst_73 = arith.constant 0.00255102036 : f32
      %173 = vector.broadcast %cst_73 : f32 to vector<16x1xf32>
      %174 = arith.mulf %172, %173 : vector<16x1xf32>
      %175 = arith.mulf %171, %171 : vector<16x1xf32>
      %176 = arith.subf %174, %175 : vector<16x1xf32>
      %c0_74 = arith.constant 0 : index
      %177 = memref.load %arg5[%c0_74] : memref<1xf32, #tpu.memory_space<smem>>
      %178 = vector.broadcast %177 : f32 to vector<16x1xf32>
      %179 = arith.addf %176, %178 : vector<16x1xf32>
      %180 = math.rsqrt %179 : vector<16x1xf32>
      %c0_75 = arith.constant 0 : index
      %c0_76 = arith.constant 0 : index
      %181 = vector.load %arg3[%c0_75, %c0_76] : memref<16x1xf32, #tpu.memory_space<vmem>>, vector<16x1xf32>
      %c0_77 = arith.constant 0 : index
      %c0_78 = arith.constant 0 : index
      %182 = vector.load %arg4[%c0_77, %c0_78] : memref<16x1xf32, #tpu.memory_space<vmem>>, vector<16x1xf32>
      %c0_79 = arith.constant 0 : index
      %183 = memref.load %arg6[%c0_79] : memref<1xf32, #tpu.memory_space<smem>>
      %184 = arith.mulf %181, %180 : vector<16x1xf32>
      %185 = vector.broadcast %183 : f32 to vector<16x1xf32>
      %186 = arith.mulf %184, %185 : vector<16x1xf32>
      %187 = arith.mulf %181, %180 : vector<16x1xf32>
      %188 = arith.mulf %171, %187 : vector<16x1xf32>
      %189 = arith.subf %182, %188 : vector<16x1xf32>
      %190 = vector.broadcast %183 : f32 to vector<16x1xf32>
      %191 = arith.mulf %189, %190 : vector<16x1xf32>
      %c0_80 = arith.constant 0 : index
      %c0_81 = arith.constant 0 : index
      %c0_82 = arith.constant 0 : index
      %192 = vector.load %arg7[%c0_80, %c0_81, %c0_82] : memref<2x16x196xf32, #tpu.memory_space<vmem>>, vector<2x16x196xf32>
      %193 = vector.shape_cast %186 : vector<16x1xf32> to vector<1x16x1xf32>
      %194 = vector.broadcast %193 : vector<1x16x1xf32> to vector<2x16x196xf32>
      %195 = arith.mulf %192, %194 : vector<2x16x196xf32>
      %196 = vector.shape_cast %191 : vector<16x1xf32> to vector<1x16x1xf32>
      %197 = vector.broadcast %196 : vector<1x16x1xf32> to vector<2x16x196xf32>
      %198 = arith.addf %195, %197 : vector<2x16x196xf32>
      %c0_83 = arith.constant 0 : index
      %c0_84 = arith.constant 0 : index
      %c0_85 = arith.constant 0 : index
      %199 = vector.load %arg7[%c0_83, %c0_84, %c0_85] : memref<2x16x196xf32, #tpu.memory_space<vmem>>, vector<2x16x196xf32>
      tpu.vector_store %arg7[%c0_83, %c0_84, %c0_85], %198 {strides = array<i32>} : memref<2x16x196xf32, #tpu.memory_space<vmem>>, vector<2x16x196xf32>,
    } else {
    }
    return
  }
  func.func @transform_0(%arg0: i32) -> (i32, i32, i32) {
    %c0_i32 = arith.constant 0 : i32
    %c0_i32_0 = arith.constant 0 : i32
    %c0_i32_1 = arith.constant 0 : i32
    return %arg0, %c0_i32, %c0_i32_0 : i32, i32, i32
  }
  func.func @transform_1(%arg0: i32) -> (i32, i32) {
    %c0_i32 = arith.constant 0 : i32
    %c0_i32_0 = arith.constant 0 : i32
    %c0_i32_1 = arith.constant 0 : i32
    return %c0_i32, %c0_i32_0 : i32, i32
  }
  func.func @transform_2(%arg0: i32) -> (i32, i32) {
    %c0_i32 = arith.constant 0 : i32
    %c0_i32_0 = arith.constant 0 : i32
    %c0_i32_1 = arith.constant 0 : i32
    return %c0_i32, %c0_i32_0 : i32, i32
  }
  func.func @transform_3(%arg0: i32) -> (i32, i32) {
    %c0_i32 = arith.constant 0 : i32
    %c0_i32_0 = arith.constant 0 : i32
    %c0_i32_1 = arith.constant 0 : i32
    return %c0_i32, %c0_i32_0 : i32, i32
  }
  func.func @transform_4(%arg0: i32) -> i32 {
    %c0_i32 = arith.constant 0 : i32
    %c0_i32_0 = arith.constant 0 : i32
    return %c0_i32 : i32
  }
  func.func @transform_5(%arg0: i32) -> i32 {
    %c0_i32 = arith.constant 0 : i32
    %c0_i32_0 = arith.constant 0 : i32
    return %c0_i32 : i32
  }
  func.func @transform_6(%arg0: i32) -> (i32, i32, i32) {
    %c0_i32 = arith.constant 0 : i32
    %c0_i32_0 = arith.constant 0 : i32
    %c0_i32_1 = arith.constant 0 : i32
    %c0_i32_2 = arith.constant 0 : i32
    return %c0_i32, %c0_i32_0, %c0_i32_1 : i32, i32, i32
  }
}

</mosaic_0001>

<bundles_post_ra>
// kernel: tpu_custom_call.1
= control target key start
LH: loop header
LB: loop body
LE: loop exit
PB: predicated region body
PF: predicated region fallthrough
CT: control target
= control target key end

     0   :  { %s1308_s0 = inlined_call_operand.vmem [shape: f32[2,3,256], index: 0, kind: input, shape index: {}]   ;;  %s1309_s1 = inlined_call_operand.vmem [shape: f32[16,27], index: 1, kind: input, shape index: {}]   ;;  %s1310_s2 = inlined_call_operand.vmem [shape: f32[16,1], index: 2, kind: input, shape index: {}]   ;;  %s1311_s3 = inlined_call_operand.vmem [shape: f32[16,1], index: 3, kind: input, shape index: {}]   ;;  %s1312_s4 = inlined_call_operand.<no memory space> [shape: f32[1], index: 4, kind: input, shape index: {}]   ;;  %s1313_s5 = inlined_call_operand.<no memory space> [shape: f32[1], index: 5, kind: input, shape index: {}]   ;;  %s1314_s6 = inlined_call_operand.hbm [shape: f32[2,16,196], index: 6, kind: output, shape index: {}]  }
   0x1   :  { %11 = sst [smem:[#allocation5]] %s1312_s4 }
   0x2   :  { %12 = sst [smem:[#allocation6]] %s1313_s5 }
   0x3   :  { %13 = vsyncpa [#allocation8], 0  ;;  %s1117_s25 = smov 0  }
   0x4 LB: > { %s1123_s26 = sadd.s32 4294967295, %s1048_s25   ;;  %p934_p0 = scmp.ge.s32.totalorder %s1048_s25, 1  ;;  %s1048_s25 = sphi %s1117_s25, %s19_s25  }
   0x5   : > { %p210_p1 = scmp.lt.s32.totalorder %s1048_s25, 3 }
   0x7   : > { %p211_p2 = pnand %p934_p0, %p210_p1 }
   0x8   : > { %p235_p3 = scmp.lt.s32.totalorder (!%p211_p2), %s1123_s26, 1  ;;  %p937_p4 = scmp.ne.s32.totalorder (!%p211_p2), %s1123_s26, 0 }
   0x9   : > { %214 = sbr.rel (%p211_p2) target bundleno = 842 (0x34a), region = 44 }
  0x10   : > { %s236_s4 = scalar_select %p235_p3, %s1123_s26, 1 }
  0x11   : > { %243 = sbr.rel (%p937_p4) target bundleno = 24 (0x18), region = 48  ;;  %vm244_vm0 = vcmask (!%p937_p4), 7168   ;;  %v1050_v0 = vmov (!%p937_p4), 0.0  }
  0x12   : > { %s950_s5 = sshll.u32 %s236_s4, 3  ;;  %245 = vst.msk [vmem:[#allocation3] sm:$0xff] (!%p937_p4), %vm244_vm0, %v1050_v0  ;;  %246 = vst.msk [vmem:[#allocation3 + $0x8] sm:$0xff] (!%p937_p4), %vm244_vm0, %v1050_v0 }
  0x13   : > { %s239_s29 = scalar_lea.vmem %s1308_s0, %s950_s5  ;;  %247 = vst.msk [vmem:[#allocation4] sm:$0xff] (!%p937_p4), %vm244_vm0, %v1050_v0  ;;  %248 = vst.msk [vmem:[#allocation4 + $0x8] sm:$0xff] (!%p937_p4), %vm244_vm0, %v1050_v0 }
  0x18 PF: > { %v261_v1 = vlaneseq  ;;  %v1051_v2 = vmov 1966171168   ;;  %v938_v4 = vld.sshfl [vmem:[%s239_s29] sm:$0x5f pattern:$0x75316420] }
  0x19   : > { %v259_v3 = vunpack.c.l.s4 %v1051_v2  ;;  %v272_v7 = vcombine.high %v938_v4, %v938_v4  ;;  %s1052_s30 = smov 126   ;;  %s1053_s7 = smov 127   ;;  %v1060_v13 = vmov 0.0   ;;  %vm317_vm2 = vcmask 1031168   ;;  %v490_v11 = vld [vmem:[%s1309_s1 + $0x8] sm:$0xff] }
  0x1a   : > { %v262_v5 = vshrl.u32 %v261_v1, 7  ;;  %vm1135_vm1 = vcmp.lt.s32.totalorder %v261_v1, 222  ;;  %s1054_s8 = smov 112   ;;  %s1055_s9 = smov 111   ;;  %577 = vmatprep.mubr.f32.mxu0 %v1060_v13  ;;  %583 = vmatprep.mubr.f32.mxu1 %v1060_v13  ;;  %vm292_vm3 = vcmask 1039360   ;;  %vm342_vm4 = vcmask 916480  }
  0x1b   : > { %v260_v6 = vunpack.c.0.s8 %v259_v3  ;;  %s1056_s10 = smov 110   ;;  %s1057_s11 = smov 96   ;;  %vm367_vm5 = vcmask 908288   ;;  %vm392_vm6 = vcmask 900096   ;;  %vm417_vm7 = vcmask 785408  }
  0x1c   : > { %s1058_s12 = smov 95   ;;  %s1059_s13 = smov 94   ;;  %vm442_vm8 = vcmask 777216   ;;  %vm467_vm9 = vcmask 769024   ;;  %vm506_vm10 = vcmask 1042432   ;;  %vm1061_vm11 = vmmov 1  }
  0x1d   : > { %v263_v8 = vsub.s32 %v260_v6, %v262_v5  ;;  %vm957_vm12 = vmpackc.low %vm506_vm10, %vm1061_vm11  ;;  %vm499_vm13 = vcmask 220160   ;;  %s951_s18 = sshll.u32 %s1123_s26, 5  ;;  %vm663_vm15 = vcmask 113664   ;;  %s1062_s20 = smov 122   ;;  %vm769_vm10 = vcmask 326864  }
  0x1e   : > { %s1221_s19 = scalar_lea.vmem [#allocation7], %s951_s18  ;;  %s1063_s21 = smov 124   ;;  %vm739_vm11 = vcmask 1032064  }
  0x1f   : > { %v264_v9 = vrot.slane %v938_v4, %v263_v8  ;;  %v279_v10 = vrot.slane %v272_v7, %v263_v8  ;;  %s1064_s22 = smov 120   ;;  %s1065_s23 = smov 118  }
  0x20   : > { %s1066_s24 = smov 116   ;;  %s1067_s4 = smov 114  }
  0x21   : > { %314 = vrot.lane.b32.xlu1 %v264_v9, %s1052_s30  ;;  %270 = vst.msk [vmem:[#allocation2] ss:$8 sm:$0x3] %vm1135_vm1, %v264_v9  ;;  %289 = vrot.lane.b32.xlu0 %v264_v9, %s1053_s7  ;;  %282 = vst.msk [vmem:[#allocation2 + $0x1] ss:$8 sm:$0x3] %vm1135_vm1, %v279_v10  ;;  %v284_v12 = vcombine.high %v264_v9, %v264_v9 }
  0x22   : > { %s1068_s5 = smov 108   ;;  %s1069_s27 = smov 106  }
  0x23   : > { %287 = vst.msk [vmem:[#allocation2 + $0x2] ss:$8 sm:$0x3] %vm1135_vm1, %v284_v12  ;;  %s1070_s28 = smov 104   ;;  %s1071_s29 = smov 102  }
  0x24   : > { %p945_p5 = scmp.ne.s32.totalorder %s1123_s26, 1 }
  0x25   : > { %298 = vrot.lane.b32.xlu0 %v279_v10, %s1053_s7  ;;  %306 = vrot.lane.b32.xlu1 %v284_v12, %s1053_s7  ;;  %s816_s7 = sld [smem:[#allocation6]] (!%p945_p5) }
  0x29   : > { %323 = vrot.lane.b32.xlu0 %v279_v10, %s1052_s30  ;;  %331 = vrot.lane.b32.xlu1 %v284_v12, %s1052_s30 }
  0x2d   : > { %339 = vrot.lane.b32.xlu0 %v264_v9, %s1054_s8  ;;  %348 = vrot.lane.b32.xlu1 %v279_v10, %s1054_s8 }
  0x31   : > { %356 = vrot.lane.b32.xlu0 %v284_v12, %s1054_s8  ;;  %364 = vrot.lane.b32.xlu1 %v264_v9, %s1055_s9 }
  0x35   : > { %373 = vrot.lane.b32.xlu0 %v279_v10, %s1055_s9  ;;  %381 = vrot.lane.b32.xlu1 %v284_v12, %s1055_s9 }
  0x39   : > { %389 = vrot.lane.b32.xlu0 %v264_v9, %s1056_s10  ;;  %398 = vrot.lane.b32.xlu1 %v279_v10, %s1056_s10 }
  0x3d   : > { %406 = vrot.lane.b32.xlu0 %v284_v12, %s1056_s10  ;;  %414 = vrot.lane.b32.xlu1 %v264_v9, %s1057_s11 }
  0x41   : > { %423 = vrot.lane.b32.xlu0 %v279_v10, %s1057_s11  ;;  %431 = vrot.lane.b32.xlu1 %v284_v12, %s1057_s11 }
  0x45   : > { %439 = vrot.lane.b32.xlu0 %v264_v9, %s1058_s12  ;;  %448 = vrot.lane.b32.xlu1 %v279_v10, %s1058_s12 }
  0x49   : > { %456 = vrot.lane.b32.xlu0 %v284_v12, %s1058_s12  ;;  %464 = vrot.lane.b32.xlu1 %v264_v9, %s1059_s13 }
  0x4d   : > { %473 = vrot.lane.b32.xlu0 %v279_v10, %s1059_s13  ;;  %481 = vrot.lane.b32.xlu1 %v284_v12, %s1059_s13 }
  0x93   : > { %v315_v14 = vpop.permute.xlu1 %314  ;;  %v290_v15 = vpop.permute.xlu0 %289 }
  0x94   : > { %v316_v16 = vrot.slane %v315_v14, 1  ;;  %v291_v17 = vrot.slane %v290_v15, 1 }
  0x96   : > { %v318_v18 = vsel %vm317_vm2, %v315_v14, %v316_v16  ;;  %v293_v19 = vsel %vm292_vm3, %v290_v15, %v291_v17 }
  0x97   : > { %321 = vst.msk [vmem:[#allocation2 + $0x6] ss:$8 sm:$0x3] %vm1135_vm1, %v318_v18  ;;  %296 = vst.msk [vmem:[#allocation2 + $0x3] ss:$8 sm:$0x3] %vm1135_vm1, %v293_v19  ;;  %v299_v20 = vpop.permute.xlu0 %298  ;;  %v307_v21 = vpop.permute.xlu1 %306 }
  0x98   : > { %v300_v22 = vrot.slane %v299_v20, 1  ;;  %v308_v23 = vrot.slane %v307_v21, 1 }
  0x9a   : > { %v301_v24 = vsel %vm292_vm3, %v299_v20, %v300_v22  ;;  %v309_v25 = vsel %vm292_vm3, %v307_v21, %v308_v23  ;;  %vm692_vm3 = vcmask 458064  }
  0x9b   : > { %304 = vst.msk [vmem:[#allocation2 + $0x4] ss:$8 sm:$0x3] %vm1135_vm1, %v301_v24  ;;  %312 = vst.msk [vmem:[#allocation2 + $0x5] ss:$8 sm:$0x3] %vm1135_vm1, %v309_v25  ;;  %v324_v26 = vpop.permute.xlu0 %323  ;;  %v332_v27 = vpop.permute.xlu1 %331 }
  0x9c   : > { %v325_v28 = vrot.slane %v324_v26, 1  ;;  %v333_v29 = vrot.slane %v332_v27, 1 }
  0x9e   : > { %v326_v30 = vsel %vm317_vm2, %v324_v26, %v325_v28  ;;  %v334_v31 = vsel %vm317_vm2, %v332_v27, %v333_v29  ;;  %vm683_vm2 = vcmask 343264  }
  0x9f   : > { %329 = vst.msk [vmem:[#allocation2 + $0x7] ss:$8 sm:$0x3] %vm1135_vm1, %v326_v30  ;;  %337 = vst.msk [vmem:[#allocation2 + $0x10] ss:$8 sm:$0x3] %vm1135_vm1, %v334_v31  ;;  %v340_v32 = vpop.permute.xlu0 %339  ;;  %v349_v33 = vpop.permute.xlu1 %348 }
  0xa0   : > { %v341_v34 = vrot.slane %v340_v32, 1  ;;  %v350_v35 = vrot.slane %v349_v33, 1 }
  0xa2   : > { %v343_v36 = vsel %vm342_vm4, %v340_v32, %v341_v34  ;;  %v351_v37 = vsel %vm342_vm4, %v349_v33, %v350_v35 }
  0xa3   : > { %346 = vst.msk [vmem:[#allocation2 + $0x11] ss:$8 sm:$0x3] %vm1135_vm1, %v343_v36  ;;  %354 = vst.msk [vmem:[#allocation2 + $0x12] ss:$8 sm:$0x3] %vm1135_vm1, %v351_v37  ;;  %v357_v38 = vpop.permute.xlu0 %356  ;;  %v365_v39 = vpop.permute.xlu1 %364 }
  0xa4   : > { %v358_v40 = vrot.slane %v357_v38, 1  ;;  %v366_v41 = vrot.slane %v365_v39, 1  ;;  %v489_v36 = vld [vmem:[%s1309_s1] sm:$0xff]  ;;  %v591_v37 = vand.u32 127, %v261_v1 }
  0xa6   : > { %v359_v42 = vsel %vm342_vm4, %v357_v38, %v358_v40  ;;  %v368_v43 = vsel %vm367_vm5, %v365_v39, %v366_v41  ;;  %v492_v3 = vld [vmem:[#allocation2 + $0x8] sm:$0xff]  ;;  %v491_v7 = vld [vmem:[#allocation2] sm:$0xff]  ;;  %v592_v38 = vadd.s32 128, %v591_v37  ;;  %v597_v39 = vand.u32 15, %v591_v37 }
  0xa7   : > { %362 = vst.msk [vmem:[#allocation2 + $0x13] ss:$8 sm:$0x3] %vm1135_vm1, %v359_v42  ;;  %371 = vst.msk [vmem:[#allocation2 + $0x14] ss:$8 sm:$0x3] %vm1135_vm1, %v368_v43  ;;  %v374_v44 = vpop.permute.xlu0 %373  ;;  %v382_v45 = vpop.permute.xlu1 %381 }
  0xa8   : > { %v375_v46 = vrot.slane %v374_v44, 1  ;;  %v383_v47 = vrot.slane %v382_v45, 1  ;;  %v604_v40 = vand.u32 15, %v592_v38  ;;  %vm617_vm14 = vcmp.lt.s32.totalorder %v597_v39, 14 }
  0xa9   : > { %vm701_vm4 = vcmask 572864   ;;  %v1072_v38 = vmov (!%p945_p5), 0  }
  0xaa   : > { %v376_v48 = vsel %vm367_vm5, %v374_v44, %v375_v46  ;;  %v384_v49 = vsel %vm367_vm5, %v382_v45, %v383_v47  ;;  %vm618_vm0 = vcmp.lt.s32.totalorder %v604_v40, 14  ;;  %vm710_vm5 = vcmask 687664   ;;  %1006 = vset.pattern.permute.xlu0 (!%p945_p5), %v1072_v38  ;;  %1007 = vset.pattern.permute.xlu1 (!%p945_p5), %v1072_v38 }
  0xab   : > { %379 = vst.msk [vmem:[#allocation2 + $0x15] ss:$8 sm:$0x3] %vm1135_vm1, %v376_v48  ;;  %387 = vst.msk [vmem:[#allocation2 + $0x16] ss:$8 sm:$0x3] %vm1135_vm1, %v384_v49  ;;  %v390_v50 = vpop.permute.xlu0 %389  ;;  %v399_v51 = vpop.permute.xlu1 %398 }
  0xac   : > { %v391_v52 = vrot.slane %v390_v50, 1  ;;  %v400_v53 = vrot.slane %v399_v51, 1 }
  0xae   : > { %v393_v54 = vsel %vm392_vm6, %v390_v50, %v391_v52  ;;  %v401_v55 = vsel %vm392_vm6, %v399_v51, %v400_v53 }
  0xaf   : > { %396 = vst.msk [vmem:[#allocation2 + $0x17] ss:$8 sm:$0x3] %vm1135_vm1, %v393_v54  ;;  %404 = vst.msk [vmem:[#allocation2 + $0x20] ss:$8 sm:$0x3] %vm1135_vm1, %v401_v55  ;;  %v407_v56 = vpop.permute.xlu0 %406  ;;  %v415_v57 = vpop.permute.xlu1 %414 }
  0xb0   : > { %v408_v58 = vrot.slane %v407_v56, 1  ;;  %v416_v59 = vrot.slane %v415_v57, 1 }
  0xb2   : > { %v409_v60 = vsel %vm392_vm6, %v407_v56, %v408_v58  ;;  %v418_v61 = vsel %vm417_vm7, %v415_v57, %v416_v59  ;;  %vm719_vm6 = vcmask 802464  }
  0xb3   : > { %412 = vst.msk [vmem:[#allocation2 + $0x21] ss:$8 sm:$0x3] %vm1135_vm1, %v409_v60  ;;  %421 = vst.msk [vmem:[#allocation2 + $0x22] ss:$8 sm:$0x3] %vm1135_vm1, %v418_v61  ;;  %v424_v62 = vpop.permute.xlu0 %423  ;;  %v432_v63 = vpop.permute.xlu1 %431 }
  0xb4   : > { %v425_v0 = vrot.slane %v424_v62, 1  ;;  %v433_v2 = vrot.slane %v432_v63, 1 }
  0xb6   : > { %v426_v4 = vsel %vm417_vm7, %v424_v62, %v425_v0  ;;  %v434_v5 = vsel %vm417_vm7, %v432_v63, %v433_v2  ;;  %v494_v6 = vld [vmem:[#allocation2 + $0x18] sm:$0xff]  ;;  %v493_v8 = vld [vmem:[#allocation2 + $0x10] sm:$0xff]  ;;  %vm728_vm7 = vcmask 917264  }
  0xb7   : > { %429 = vst.msk [vmem:[#allocation2 + $0x23] ss:$8 sm:$0x3] %vm1135_vm1, %v426_v4  ;;  %437 = vst.msk [vmem:[#allocation2 + $0x24] ss:$8 sm:$0x3] %vm1135_vm1, %v434_v5  ;;  %v440_v9 = vpop.permute.xlu0 %439  ;;  %v449_v10 = vpop.permute.xlu1 %448  ;;  %v952_v12 = vpack.c.bf16 %v494_v6, %v492_v3  ;;  %v954_v13 = vpack.c.bf16 %v493_v8, %v491_v7 }
  0xb8   : > { %v441_v14 = vrot.slane %v440_v9, 1  ;;  %v450_v15 = vrot.slane %v449_v10, 1 }
  0xb9   : > { %953 = vmatprep.subr.bf16.mxu0 %v952_v12  ;;  %962 = vmatprep.subr.bf16.mxu1 %v952_v12 }
  0xba   : > { %v443_v16 = vsel %vm442_vm8, %v440_v9, %v441_v14  ;;  %v451_v17 = vsel %vm442_vm8, %v449_v10, %v450_v15  ;;  %955 = vmatpush1.bf16.msra.mxu0 %v954_v13  ;;  %964 = vmatpush1.bf16.msra.mxu1 %v954_v13 }
  0xbb   : > { %446 = vst.msk [vmem:[#allocation2 + $0x25] ss:$8 sm:$0x3] %vm1135_vm1, %v443_v16  ;;  %454 = vst.msk [vmem:[#allocation2 + $0x26] ss:$8 sm:$0x3] %vm1135_vm1, %v451_v17  ;;  %v457_v18 = vpop.permute.xlu0 %456  ;;  %v465_v19 = vpop.permute.xlu1 %464 }
  0xbc   : > { %v458_v20 = vrot.slane %v457_v18, 1  ;;  %v466_v21 = vrot.slane %v465_v19, 1 }
  0xbe   : > { %v459_v22 = vsel %vm442_vm8, %v457_v18, %v458_v20  ;;  %v468_v23 = vsel %vm467_vm9, %v465_v19, %v466_v21  ;;  %vm750_vm8 = vcmask 97280  }
  0xbf   : > { %462 = vst.msk [vmem:[#allocation2 + $0x27] ss:$8 sm:$0x3] %vm1135_vm1, %v459_v22  ;;  %471 = vst.msk [vmem:[#allocation2 + $0x30] ss:$8 sm:$0x3] %vm1135_vm1, %v468_v23  ;;  %v474_v24 = vpop.permute.xlu0 %473  ;;  %v482_v25 = vpop.permute.xlu1 %481 }
  0xc0   : > { %v475_v26 = vrot.slane %v474_v24, 1  ;;  %v483_v27 = vrot.slane %v482_v25, 1  ;;  %v627_v22 = vld [vmem:[#allocation3] sm:$0xff] }
  0xc2   : > { %v476_v28 = vsel %vm467_vm9, %v474_v24, %v475_v26  ;;  %v484_v29 = vsel %vm467_vm9, %v482_v25, %v483_v27  ;;  %v642_v25 = vld [vmem:[#allocation4] sm:$0xff] }
  0xc3   : > { %479 = vst.msk [vmem:[#allocation2 + $0x31] ss:$8 sm:$0x3] %vm1135_vm1, %v476_v28  ;;  %487 = vst.msk [vmem:[#allocation2 + $0x32] ss:$8 sm:$0x3] %vm1135_vm1, %v484_v29 }
  0xc4   : > { %vm674_vm1 = vcmask 228464   ;;  %v643_v28 = vld [vmem:[#allocation4 + $0x8] sm:$0xff] }
  0xc6   : > { %v496_v30 = vld [vmem:[#allocation2 + $0x28] sm:$0xff]  ;;  %v495_v32 = vld [vmem:[#allocation2 + $0x20] sm:$0xff] }
  0xca   : > { %v498_v31 = vld [vmem:[#allocation2 + $0x38] sm:$0x7]  ;;  %v497_v33 = vld [vmem:[#allocation2 + $0x30] sm:$0x7] }
  0xcb   : > { %v956_v34 = vpack.c.bf16 %v498_v31, %v496_v30  ;;  %v959_v35 = vpack.c.bf16 %v497_v33, %v495_v32  ;;  %v628_v31 = vld [vmem:[#allocation3 + $0x8] sm:$0xff] }
  0xcd   : > { %958 = vmatprep.subr.msk.bf16.mxu0 %vm957_vm12, %v956_v34  ;;  %963 = vmatprep.subr.msk.bf16.mxu1 %vm957_vm12, %v956_v34 }
  0xce   : > { %961 = vmatpush1.bf16.msk.msra.mxu0 %vm957_vm12, %v959_v35  ;;  %965 = vmatpush1.bf16.msk.msra.mxu1 %vm957_vm12, %v959_v35  ;;  %vm748_vm12 = vcmask 1048560  }
  0xd1   : > { %941 = vmatmul.mubr.msk.f32.vlgmr.msra.gmra.mrb[0].mxu0 %vm499_vm13, %v489_v36  ;;  %942 = vmatmul.mubr.msk.f32.vlgmr.msra.gmra.mrb[0].mxu1 %vm499_vm13, %v490_v11  ;;  %vm778_vm13 = vcmask 441664  }
 0x1a4   : > { %v579_v41 = vpop.f32.mrb[0].mxu0  ;;  %v585_v42 = vpop.f32.mrb[0].mxu1 }
 0x1a5   : > { %670 = vrot.lane.b32.xlu0 %v585_v42, %s1052_s30  ;;  %668 = vrot.lane.b32.xlu1 %v579_v41, %s1052_s30  ;;  %v581_v43 = vpop.f32.mrb[1].mxu0  ;;  %v587_v44 = vpop.f32.mrb[1].mxu1  ;;  %v623_v45 = vsel %vm617_vm14, %v579_v41, 0.0  ;;  %v625_v46 = vsel %vm617_vm14, %v585_v42, 0.0  ;;  %665 = vst.msk [vmem:[%s1221_s19 + $0x10] sm:$0xff] %vm663_vm15, %v585_v42  ;;  %664 = vst.msk [vmem:[%s1221_s19] sm:$0xff] %vm663_vm15, %v579_v41 }
 0x1a6   : > { %v624_v1 = vsel %vm618_vm0, %v581_v43, 0.0  ;;  %v626_v47 = vsel %vm618_vm0, %v587_v44, 0.0  ;;  %v646_v48 = vmul.f32 %v625_v46, %v625_v46  ;;  %v644_v54 = vmul.f32 %v623_v45, %v623_v45  ;;  %s806_s30 = sld [smem:[#allocation5]] (!%p945_p5) }
 0x1a7   : > { %v629_v49 = vsel %vm467_vm9, %v624_v1, 0.0  ;;  %v645_v50 = vmul.f32 %v624_v1, %v624_v1  ;;  %v647_v51 = vmul.f32 %v626_v47, %v626_v47  ;;  %v633_v52 = vsel %vm467_vm9, %v626_v47, 0.0 }
 0x1a8   : > { %v630_v53 = vadd.f32 %v629_v49, %v623_v45  ;;  %v634_v55 = vadd.f32 %v633_v52, %v625_v46  ;;  %vm639_vm14 = vcmask 7168   ;;  %vm787_vm15 = vcmask 556464  }
 0x1a9   : > { %686 = vrot.lane.b32.xlu0 %v579_v41, %s1062_s20  ;;  %677 = vrot.lane.b32.xlu1 %v579_v41, %s1063_s21  ;;  %v648_v56 = vsel %vm467_vm9, %v645_v50, 0.0  ;;  %v652_v57 = vsel %vm467_vm9, %v647_v51, 0.0  ;;  %vm760_vm9 = vcmask 212064   ;;  %v812_v50 = vld [vmem:[%s1310_s2] sm:$0xff] (!%p945_p5)  ;;  %v813_v51 = vld [vmem:[%s1310_s2 + $0x8] sm:$0xff] (!%p945_p5)  ;;  %vm873_vm0 = vcmask (!%p945_p5), 556032  }
 0x1aa   : > { %v649_v58 = vadd.f32 %v648_v56, %v644_v54  ;;  %v653_v59 = vadd.f32 %v652_v57, %v646_v48  ;;  %v814_v56 = vld [vmem:[%s1311_s3] sm:$0xff] (!%p945_p5) }
 0x1ac   : > { %v807_v47 = vstv (!%p945_p5), %s806_s30 }
 0x1ad   : > { %695 = vrot.lane.b32.xlu0 %v579_v41, %s1064_s22  ;;  %679 = vrot.lane.b32.xlu1 %v585_v42, %s1063_s21 }
 0x1b1   : > { %704 = vrot.lane.b32.xlu0 %v579_v41, %s1065_s23  ;;  %688 = vrot.lane.b32.xlu1 %v585_v42, %s1062_s20 }
 0x1b5   : > { %713 = vrot.lane.b32.xlu0 %v579_v41, %s1066_s24  ;;  %697 = vrot.lane.b32.xlu1 %v585_v42, %s1064_s22 }
 0x1b9   : > { %722 = vrot.lane.b32.xlu0 %v579_v41, %s1067_s4  ;;  %706 = vrot.lane.b32.xlu1 %v585_v42, %s1065_s23 }
 0x1bd   : > { %715 = vrot.lane.b32.xlu1 %v585_v42, %s1066_s24  ;;  %742 = vrot.lane.b32.xlu0 %v581_v43, %s1056_s10 }
 0x1c1   : > { %724 = vrot.lane.b32.xlu1 %v585_v42, %s1067_s4  ;;  %754 = vrot.lane.b32.xlu0 %v581_v43, %s1068_s5 }
 0x1c5   : > { %744 = vrot.lane.b32.xlu1 %v587_v44, %s1056_s10  ;;  %763 = vrot.lane.b32.xlu0 %v581_v43, %s1069_s27 }
 0x1c9   : > { %756 = vrot.lane.b32.xlu1 %v587_v44, %s1068_s5  ;;  %733 = vrot.lane.b32.xlu0 %v581_v43, %s1054_s8 }
 0x1cd   : > { %765 = vrot.lane.b32.xlu1 %v587_v44, %s1069_s27  ;;  %772 = vrot.lane.b32.xlu0 %v581_v43, %s1070_s28 }
 0x1d1   : > { %735 = vrot.lane.b32.xlu1 %v587_v44, %s1054_s8 }
 0x1d5   : > { %774 = vrot.lane.b32.xlu1 %v587_v44, %s1070_s28 }
 0x1ec   : > { %631 = vadd.xlane.f32.xlu0 %v630_v53  ;;  %v819_v53 = vstv (!%p945_p5), %s816_s7 }
 0x1f0   : > { %650 = vadd.xlane.f32.xlu0 %v649_v58 }
 0x1f4   : > { %654 = vadd.xlane.f32.xlu0 %v653_v59 }
 0x1f9   : > { %635 = vadd.xlane.f32.xlu1 %v634_v55 }
 0x20a   : > { %783 = vrot.lane.b32.xlu1 %v587_v44, %s1071_s29  ;;  %781 = vrot.lane.b32.xlu0 %v581_v43, %s1071_s29 }
 0x217   : > { %v671_v60 = vpop.permute.xlu0 %670  ;;  %v669_v61 = vpop.permute.xlu1 %668 }
 0x218   : > { %676 = vst.msk [vmem:[%s1221_s19 + $0x10] sm:$0xff] %vm674_vm1, %v671_v60  ;;  %675 = vst.msk [vmem:[%s1221_s19] sm:$0xff] %vm674_vm1, %v669_v61  ;;  %v815_v60 = vld [vmem:[%s1311_s3 + $0x8] sm:$0xff] (!%p945_p5) }
 0x21b   : > { %v687_v62 = vpop.permute.xlu0 %686  ;;  %v678_v63 = vpop.permute.xlu1 %677 }
 0x21c   : > { %684 = vst.msk [vmem:[%s1221_s19] sm:$0xff] %vm683_vm2, %v678_v63 }
 0x21d   : > { %693 = vst.msk [vmem:[%s1221_s19] sm:$0xff] %vm692_vm3, %v687_v62 }
 0x21f   : > { %v696_v0 = vpop.permute.xlu0 %695  ;;  %v680_v2 = vpop.permute.xlu1 %679 }
 0x220   : > { %702 = vst.msk [vmem:[%s1221_s19] sm:$0xff] %vm701_vm4, %v696_v0 }
 0x221   : > { %685 = vst.msk [vmem:[%s1221_s19 + $0x10] sm:$0xff] %vm683_vm2, %v680_v2 }
 0x223   : > { %v705_v3 = vpop.permute.xlu0 %704  ;;  %v689_v4 = vpop.permute.xlu1 %688 }
 0x224   : > { %711 = vst.msk [vmem:[%s1221_s19] sm:$0xff] %vm710_vm5, %v705_v3 }
 0x225   : > { %694 = vst.msk [vmem:[%s1221_s19 + $0x10] sm:$0xff] %vm692_vm3, %v689_v4 }
 0x227   : > { %v714_v5 = vpop.permute.xlu0 %713  ;;  %v698_v6 = vpop.permute.xlu1 %697 }
 0x228   : > { %720 = vst.msk [vmem:[%s1221_s19] sm:$0xff] %vm719_vm6, %v714_v5 }
 0x229   : > { %703 = vst.msk [vmem:[%s1221_s19 + $0x10] sm:$0xff] %vm701_vm4, %v698_v6 }
 0x22b   : > { %v723_v7 = vpop.permute.xlu0 %722  ;;  %v707_v8 = vpop.permute.xlu1 %706 }
 0x22c   : > { %729 = vst.msk [vmem:[%s1221_s19] sm:$0xff] %vm728_vm7, %v723_v7 }
 0x22d   : > { %712 = vst.msk [vmem:[%s1221_s19 + $0x10] sm:$0xff] %vm710_vm5, %v707_v8 }
 0x22f   : > { %v716_v9 = vpop.permute.xlu1 %715  ;;  %v743_v10 = vpop.permute.xlu0 %742 }
 0x230   : > { %721 = vst.msk [vmem:[%s1221_s19 + $0x10] sm:$0xff] %vm719_vm6, %v716_v9 }
 0x231   : > { %751 = vst.msk [vmem:[%s1221_s19 + $0x8] sm:$0xff] %vm750_vm8, %v743_v10 }
 0x233   : > { %v725_v12 = vpop.permute.xlu1 %724  ;;  %v755_v13 = vpop.permute.xlu0 %754 }
 0x234   : > { %730 = vst.msk [vmem:[%s1221_s19 + $0x10] sm:$0xff] %vm728_vm7, %v725_v12 }
 0x235   : > { %761 = vst.msk [vmem:[%s1221_s19 + $0x8] sm:$0xff] %vm760_vm9, %v755_v13 }
 0x237   : > { %v745_v14 = vpop.permute.xlu1 %744  ;;  %v764_v15 = vpop.permute.xlu0 %763 }
 0x238   : > { %753 = vst.msk [vmem:[%s1221_s19 + $0x18] sm:$0xff] %vm750_vm8, %v745_v14 }
 0x239   : > { %770 = vst.msk [vmem:[%s1221_s19 + $0x8] sm:$0xff] %vm769_vm10, %v764_v15 }
 0x23b   : > { %v757_v16 = vpop.permute.xlu1 %756  ;;  %v734_v17 = vpop.permute.xlu0 %733 }
 0x23c   : > { %762 = vst.msk [vmem:[%s1221_s19 + $0x18] sm:$0xff] %vm760_vm9, %v757_v16 }
 0x23d   : > { %740 = vst.msk [vmem:[%s1221_s19] sm:$0xff] %vm739_vm11, %v734_v17 }
 0x23e   : > { %749 = vst.msk [vmem:[%s1221_s19] sm:$0xff] %vm748_vm12, %v743_v10 }
 0x23f   : > { %v766_v18 = vpop.permute.xlu1 %765  ;;  %v773_v19 = vpop.permute.xlu0 %772 }
 0x240   : > { %771 = vst.msk [vmem:[%s1221_s19 + $0x18] sm:$0xff] %vm769_vm10, %v766_v18 }
 0x241   : > { %779 = vst.msk [vmem:[%s1221_s19 + $0x8] sm:$0xff] %vm778_vm13, %v773_v19 }
 0x243   : > { %v736_v20 = vpop.permute.xlu1 %735 }
 0x244   : > { %741 = vst.msk [vmem:[%s1221_s19 + $0x10] sm:$0xff] %vm739_vm11, %v736_v20 }
 0x245   : > { %752 = vst.msk [vmem:[%s1221_s19 + $0x10] sm:$0xff] %vm748_vm12, %v745_v14 }
 0x247   : > { %v775_v21 = vpop.permute.xlu1 %774 }
 0x248   : > { %780 = vst.msk [vmem:[%s1221_s19 + $0x18] sm:$0xff] %vm778_vm13, %v775_v21 }
 0x279   : > { %v632_v23 = vpop.xlane.xlu0 %631 }
 0x27a   : > { %v637_v24 = vadd.f32 %v632_v23, %v627_v22 }
 0x27c   : > { %640 = vst.msk [vmem:[#allocation3] sm:$0xff] %vm639_vm14, %v637_v24 }
 0x27d   : > { %v651_v26 = vpop.xlane.xlu0 %650 }
 0x27e   : > { %v656_v27 = vadd.f32 %v651_v26, %v642_v25 }
 0x280   : > { %658 = vst.msk [vmem:[#allocation4] sm:$0xff] %vm639_vm14, %v656_v27 }
 0x281   : > { %v655_v29 = vpop.xlane.xlu0 %654 }
 0x282   : > { %v657_v30 = vadd.f32 %v655_v29, %v643_v28 }
 0x283   : > { %v794_v36 = vld [vmem:[#allocation3] sm:$0xff] (!%p945_p5) }
 0x284   : > { %659 = vst.msk [vmem:[#allocation4 + $0x8] sm:$0xff] %vm639_vm14, %v657_v30  ;;  %v796_v39 = vmul.f32 (!%p945_p5), 0.0025510204, %v794_v36 }
 0x285   : > { %v782_v32 = vpop.permute.xlu0 %781  ;;  %793 = sbr.rel (%p945_p5) target bundleno = 816 (0x330), region = 52 }
 0x286   : > { %788 = vst.msk [vmem:[%s1221_s19 + $0x8] sm:$0xff] %vm787_vm15, %v782_v32  ;;  %v636_v33 = vpop.xlane.xlu1 %635  ;;  %v802_v44 = vmul.f32 (!%p945_p5), %v796_v39, %v796_v39 }
 0x287   : > { %v638_v34 = vadd.f32 %v636_v33, %v628_v31  ;;  %v798_v37 = vld [vmem:[#allocation4] sm:$0xff] (!%p945_p5) }
 0x288   : > { %v800_v42 = vmul.f32 (!%p945_p5), 0.0025510204, %v798_v37 }
 0x289   : > { %641 = vst.msk [vmem:[#allocation3 + $0x8] sm:$0xff] %vm639_vm14, %v638_v34 }
 0x28a   : > { %v784_v35 = vpop.permute.xlu1 %783  ;;  %v804_v46 = vsub.f32 (!%p945_p5), %v800_v42, %v802_v44 }
 0x28b   : > { %789 = vst.msk [vmem:[%s1221_s19 + $0x18] sm:$0xff] %vm787_vm15, %v784_v35  ;;  %v799_v41 = vld [vmem:[#allocation4 + $0x8] sm:$0xff] (!%p945_p5) }
 0x28c   : > { %v801_v43 = vmul.f32 0.0025510204, %v799_v41  ;;  %v808_v48 = vadd.f32 %v807_v47, %v804_v46 }
 0x28e   : > { %1008 = vrsqrt.f32 %v808_v48 }
 0x290   : > { %v795_v11 = vld [vmem:[#allocation3 + $0x8] sm:$0xff] }
 0x291   : > { %v797_v40 = vmul.f32 0.0025510204, %v795_v11 }
 0x292   : > { %v828_v4 = vld [vmem:[#allocation7] sm:$0xff]  ;;  %v829_v5 = vld [vmem:[#allocation7 + $0x8] sm:$0xff]  ;;  %v830_v14 = vld [vmem:[#allocation7 + $0x10] sm:$0xff] }
 0x293   : > { %v803_v45 = vmul.f32 %v797_v40, %v797_v40  ;;  %v832_v6 = vld [vmem:[#allocation7 + $0x20] sm:$0xff]  ;;  %v833_v7 = vld [vmem:[#allocation7 + $0x28] sm:$0xff]  ;;  %v831_v16 = vld [vmem:[#allocation7 + $0x18] sm:$0xff] }
 0x294   : > { %v834_v17 = vld [vmem:[#allocation7 + $0x30] sm:$0xff]  ;;  %v835_v18 = vld [vmem:[#allocation7 + $0x38] sm:$0xff] }
 0x295   : > { %v805_v1 = vsub.f32 %v801_v43, %v803_v45 }
 0x297   : > { %v809_v49 = vadd.f32 %v807_v47, %v805_v1 }
 0x298   : > { %v1009_v52 = vpop.eup %1008 }
 0x299   : > { %1010 = vrsqrt.f32 %v809_v49  ;;  %v817_v55 = vmul.f32 %v1009_v52, %v812_v50 }
 0x29b   : > { %v820_v58 = vmul.f32 %v819_v53, %v817_v55  ;;  %v822_v59 = vmul.f32 %v817_v55, %v796_v39 }
 0x29d   : > { %838 = vperm.xlu0 %1006, %v820_v58   ;;  %v824_v62 = vsub.f32 %v814_v56, %v822_v59 }
 0x29f   : > { %v826_v2 = vmul.f32 %v824_v62, %v819_v53 }
 0x2a1   : > { %856 = vperm.xlu1 %1007, %v826_v2  }
 0x2a3   : > { %v1011_v54 = vpop.eup %1010 }
 0x2a4   : > { %v818_v57 = vmul.f32 %v1011_v54, %v813_v51 }
 0x2a6   : > { %v823_v61 = vmul.f32 %v818_v57, %v797_v40  ;;  %v821_v63 = vmul.f32 %v819_v53, %v818_v57 }
 0x2a8   : > { %v825_v0 = vsub.f32 %v815_v60, %v823_v61  ;;  %843 = vperm.xlu0 %1006, %v821_v63  }
 0x2aa   : > { %v827_v3 = vmul.f32 %v825_v0, %v819_v53 }
 0x2ac   : > { %861 = vperm.xlu1 %1007, %v827_v3  }
 0x31c   : > { %v839_v8 = vpop.permute.xlu0 %838 }
 0x31d   : > { %v846_v9 = vmul.f32 %v839_v8, %v828_v4  ;;  %v847_v10 = vmul.f32 %v839_v8, %v829_v5  ;;  %v850_v12 = vmul.f32 %v839_v8, %v832_v6  ;;  %v851_v13 = vmul.f32 %v839_v8, %v833_v7 }
 0x320   : > { %v857_v15 = vpop.permute.xlu1 %856 }
 0x321   : > { %v864_v20 = vadd.f32 %v857_v15, %v846_v9  ;;  %v865_v21 = vadd.f32 %v857_v15, %v847_v10  ;;  %v868_v22 = vadd.f32 %v857_v15, %v850_v12  ;;  %v869_v23 = vadd.f32 %v857_v15, %v851_v13 }
 0x323   : > { %872 = vst [vmem:[#allocation7] sm:$0xff] %v864_v20  ;;  %874 = vst.msk [vmem:[#allocation7 + $0x8] sm:$0xff] %vm873_vm0, %v865_v21 }
 0x324   : > { %877 = vst [vmem:[#allocation7 + $0x20] sm:$0xff] %v868_v22  ;;  %878 = vst.msk [vmem:[#allocation7 + $0x28] sm:$0xff] %vm873_vm0, %v869_v23 }
 0x327   : > { %v844_v19 = vpop.permute.xlu0 %843 }
 0x328   : > { %v848_v24 = vmul.f32 %v844_v19, %v830_v14  ;;  %v849_v25 = vmul.f32 %v844_v19, %v831_v16  ;;  %v852_v26 = vmul.f32 %v844_v19, %v834_v17  ;;  %v853_v27 = vmul.f32 %v844_v19, %v835_v18 }
 0x32b   : > { %v862_v28 = vpop.permute.xlu1 %861 }
 0x32c   : > { %v866_v29 = vadd.f32 %v862_v28, %v848_v24  ;;  %v867_v30 = vadd.f32 %v862_v28, %v849_v25  ;;  %v870_v31 = vadd.f32 %v862_v28, %v852_v26  ;;  %v871_v32 = vadd.f32 %v862_v28, %v853_v27 }
 0x32e   : > { %875 = vst [vmem:[#allocation7 + $0x10] sm:$0xff] %v866_v29  ;;  %876 = vst.msk [vmem:[#allocation7 + $0x18] sm:$0xff] %vm873_vm0, %v867_v30 }
 0x32f   : > { %879 = vst [vmem:[#allocation7 + $0x30] sm:$0xff] %v870_v31  ;;  %880 = vst.msk [vmem:[#allocation7 + $0x38] sm:$0xff] %vm873_vm0, %v871_v32 }
 0x330 PF: > { %p970_p6 = scmp.eq.s32.totalorder %s1123_s26, 1  ;;  %s1073_s16 = smov [#allocation7]  }
 0x331   : > { %s887_s17 = sshll.u32 %s1073_s16, 4  ;;  %s888_s17 = int_to_ptr.vmem [resolvable:$true] %s887_s17 }
 0x332   : > { %s1012_s18 = scalar_lea.vmem %s888_s17, 1024  ;;  %p1019_p10 = scmp.lt.s32.totalorder %s888_s17, %s888_s17 }
 0x333   : > { %p1013_p7 = scmp.ne.s32.totalorder %s888_s17, %s1012_s18  ;;  %p1020_p11 = scmp.lt.s32.totalorder %s1012_s18, %s1012_s18 }
 0x335   : > { %p1014_p8 = pnand %p1013_p7, %p970_p6  ;;  %p1021_p12 = por %p1020_p11, %p1019_p10 }
 0x337   : > { %p1015_p9 = pneg %p1014_p8 }
 0x339   : > { %p1022_p13 = pnand %p1021_p12, %p1015_p9 }
 0x33b   : > { %1025 = shalt.err (!%p1022_p13)
}
 0x33c   : > { %s1026_s21 = scalar_lea.hbm %s1314_s6, 1024 }
 0x33d   : > { %p1027_p0 = scmp.ne.s32.totalorder %s1314_s6, %s1026_s21  ;;  %p1032_p3 = scmp.lt.u32.totalorder %s1026_s21, %s1314_s6 }
 0x33f   : > { %p1028_p1 = pnand %p1027_p0, %p970_p6 }
 0x341   : > { %p1029_p2 = pneg %p1028_p1 }
 0x343   : > { %p1034_p4 = pnand %p1032_p3, %p1029_p2 }
 0x345   : > { %1037 = shalt.err (!%p1034_p4)
}
 0x346   : > { %s1074_s5 = smov 256   ;;  %s1075_s27 = smov 16  }
 0x347   : > { %967 = dma.vmem_to_hbm [thread:$0]  (%p970_p6), %s888_s17, 1024, %s1314_s6, [#allocation8], %s1074_s5, %s1074_s5, %s1075_s27  }
 0x348   : > { %1043 = dma.done.wait (%p970_p6), [#allocation8], 1024  }
 0x349   : > { %1045 = vsyncadd (%p970_p6), [#allocation8], 4294966272 }
 0x34a PF: > { %s19_s25 = sadd.s32 1, %s1048_s25  }
 0x34b   : > { %p16_p5 = scmp.ge.s32.totalorder %s19_s25, 4  }
 0x34d   :  { %18 = sbr.rel (!%p16_p5) target bundleno = 4 (0x4), region = 106 }
 0x354   :  { %903 = vsyncpa [#allocation8], 1 }
 0x355   :  { %905 = vsyncpa [#allocation8 + $0x1], 1 }

</bundles_post_ra>
